<compile_context>
chip_gen: v7x
topology: tpu7x:2x2x1
jax: 0.10.0
libtpu: 0.0.40
codegen_flags: <defaults>
</compile_context>

<pallas_src>
import functools

import jax
import jax.numpy as jnp
from jax.experimental import pallas as pl
from jax.experimental.pallas import tpu as pltpu

N_OBSERVATIONS = 4
N_ACTIONS = 5
H1, H2, H3 = 256, 256, 128

# Largest per-step batch tile.  Keeps double-buffered x/out blocks +
# in-kernel activations + weights comfortably under v7x's default scoped
# VMEM (~32 MiB of 64 MiB physical); v5e/v6e (128 MiB) fit easily.
MAX_BATCH_TILE = 2048


def _qlearning_kernel(x_ref,
                      w1_ref, b1_ref,
                      w2_ref, b2_ref,
                      w3_ref, b3_ref,
                      w4_ref, b4_ref,
                      o_ref):
    # Weights are bf16 (MXU-native); dots take bf16 operands and accumulate
    # in f32.  Bias-add / ReLU stay in f32.
    x = x_ref[...].astype(jnp.bfloat16)

    h = jnp.dot(x, w1_ref[...], preferred_element_type=jnp.float32) + b1_ref[...]
    h = jnp.maximum(h, 0.0)

    h = jnp.dot(h.astype(jnp.bfloat16), w2_ref[...],
                preferred_element_type=jnp.float32) + b2_ref[...]
    h = jnp.maximum(h, 0.0)

    h = jnp.dot(h.astype(jnp.bfloat16), w3_ref[...],
                preferred_element_type=jnp.float32) + b3_ref[...]
    h = jnp.maximum(h, 0.0)

    out = jnp.dot(h.astype(jnp.bfloat16), w4_ref[...],
                  preferred_element_type=jnp.float32) + b4_ref[...]
    o_ref[...] = out.astype(o_ref.dtype)   # narrow (tile, N_ACTIONS) f32 store


@functools.partial(jax.jit, static_argnames=("batch_tile",))
def qlearning_forward(x, params, *, batch_tile=1024):
    """x: [B, N_OBSERVATIONS] float32. params: output of prepare_params().

    Returns [B, N_ACTIONS] float32 Q-values.
    """
    (w1, b1), (w2, b2), (w3, b3), (w4, b4) = params
    B, F = x.shape
    assert F == N_OBSERVATIONS
    batch_tile = min(batch_tile, MAX_BATCH_TILE)
    assert batch_tile % 128 == 0, "batch_tile must be a multiple of 128"

    if B < 256:
        # Latency path: single gridless invocation, sublane-aligned batch.
        tile = max(8, ((B + 7) // 8) * 8)
    else:
        # Throughput path: at least 2 grid steps so a v7x megacore can shard
        # the batch axis across both TensorCores; MXU-aligned tile.
        half = ((pl.cdiv(B, 2) + 127) // 128) * 128
        tile = min(batch_tile, half)

    n_tiles = pl.cdiv(B, tile)
    b_pad = n_tiles * tile
    if b_pad != B:
        x = jnp.pad(x, ((0, b_pad - B), (0, 0)))

    args = (x, w1, b1, w2, b2, w3, b3, w4, b4)
    out_shape = jax.ShapeDtypeStruct((b_pad, N_ACTIONS), jnp.float32)

    if n_tiles == 1:
        # Gridless: everything resident in VMEM, no pipeline overhead.
        out = pl.pallas_call(_qlearning_kernel, out_shape=out_shape)(*args)
    else:
        def rep(a):
            nd = a.ndim
            return pl.BlockSpec(a.shape, lambda i, _nd=nd: (0,) * _nd)

        out = pl.pallas_call(
            _qlearning_kernel,
            out_shape=out_shape,
            grid_spec=pl.GridSpec(
                grid=(n_tiles,),
                in_specs=[
                    pl.BlockSpec((tile, N_OBSERVATIONS), lambda i: (i, 0)),
                    rep(w1), rep(b1),
                    rep(w2), rep(b2),
                    rep(w3), rep(b3),
                    rep(w4), rep(b4),
                ],
                out_specs=pl.BlockSpec((tile, N_ACTIONS), lambda i: (i, 0)),
            ),
            compiler_params=pltpu.CompilerParams(
                dimension_semantics=("parallel",),
            ),
        )(*args)

    return out if b_pad == B else out[:B]


def init_params(key):
    """nn.Linear-style init: U(-1/sqrt(fan_in), +1/sqrt(fan_in)), f32.

    Weights stored as [in, out] (transposed vs. PyTorch), biases as [1, out].
    """
    dims = [(N_OBSERVATIONS, H1), (H1, H2), (H2, H3), (H3, N_ACTIONS)]
    params = []
    for (fan_in, fan_out) in dims:
        key, kw, kb = jax.random.split(key, 3)
        bound = 1.0 / jnp.sqrt(jnp.float32(fan_in))
        w = jax.random.uniform(kw, (fan_in, fan_out), jnp.float32, -bound, bound)
        b = jax.random.uniform(kb, (1, fan_out), jnp.float32, -bound, bound)
        params.append((w, b))
    return params


def prepare_params(params_f32):
    """One-time param prep (outside jit): bf16 weights, f32 biases."""
    return tuple((w.astype(jnp.bfloat16), b.astype(jnp.float32))
                 for (w, b) in params_f32)


def qlearning_ref_f32(x, params_f32):
    """Pure-f32 JAX reference (matches the PyTorch module exactly)."""
    (w1, b1), (w2, b2), (w3, b3), (w4, b4) = params_f32
    h = jnp.maximum(x @ w1 + b1, 0.0)
    h = jnp.maximum(h @ w2 + b2, 0.0)
    h = jnp.maximum(h @ w3 + b3, 0.0)
    return h @ w4 + b4


def qlearning_ref_bf16(x, params_prepared):
    """JAX reference mirroring the kernel's bf16-in / f32-accumulate math."""
    h = x
    for i, (w, b) in enumerate(params_prepared):
        h = jnp.dot(h.astype(jnp.bfloat16), w,
                    preferred_element_type=jnp.float32) + b
        if i < 3:
            h = jnp.maximum(h, 0.0)
    return h


if __name__ == "__main__":
    key = jax.random.PRNGKey(0)
    key, kx1, kx2 = jax.random.split(key, 3)
    params_f32 = init_params(key)
    params = prepare_params(params_f32)

    # Small / latency path: gridless single invocation.
    B_small = 64
    x_small = jax.random.normal(kx1, (B_small, N_OBSERVATIONS), jnp.float32)
    out_small = jax.block_until_ready(qlearning_forward(x_small, params))
    assert out_small.shape == (B_small, N_ACTIONS)
    assert out_small.dtype == jnp.float32
    ref_b = qlearning_ref_bf16(x_small, params)
    ref_f = qlearning_ref_f32(x_small, params_f32)
    assert jnp.allclose(out_small, ref_b, atol=1e-3, rtol=1e-3), \
        "gridless path mismatch vs bf16 reference"
    assert jnp.allclose(out_small, ref_f, atol=3e-2, rtol=3e-2), \
        "gridless path mismatch vs f32 reference"

    # Tiled path: ragged batch, >=2 parallel grid steps (exercises batch
    # padding, replicated weight specs, narrow lane output).
    B_big = 300
    x_big = jax.random.normal(kx2, (B_big, N_OBSERVATIONS), jnp.float32)
    out_big = jax.block_until_ready(qlearning_forward(x_big, params))
    assert out_big.shape == (B_big, N_ACTIONS)
    ref_b = qlearning_ref_bf16(x_big, params)
    ref_f = qlearning_ref_f32(x_big, params_f32)
    assert jnp.allclose(out_big, ref_b, atol=1e-3, rtol=1e-3), \
        "tiled path mismatch vs bf16 reference"
    assert jnp.allclose(out_big, ref_f, atol=3e-2, rtol=3e-2), \
        "tiled path mismatch vs f32 reference"

    print("KERNEL_OK")
</pallas_src>

<mosaic_0001>
module attributes {stable_mosaic.version = 11 : i64} {
  func.func @_qlearning_kernel(%arg0: memref<64x4xf32, #tpu.memory_space<vmem>>, %arg1: memref<4x256xbf16, #tpu.memory_space<vmem>>, %arg2: memref<1x256xf32, #tpu.memory_space<vmem>>, %arg3: memref<256x256xbf16, #tpu.memory_space<vmem>>, %arg4: memref<1x256xf32, #tpu.memory_space<vmem>>, %arg5: memref<256x128xbf16, #tpu.memory_space<vmem>>, %arg6: memref<1x128xf32, #tpu.memory_space<vmem>>, %arg7: memref<128x5xbf16, #tpu.memory_space<vmem>>, %arg8: memref<1x5xf32, #tpu.memory_space<vmem>>, %arg9: memref<64x5xf32, #tpu.memory_space<vmem>>) attributes {dimension_semantics = [], scalar_prefetch = 0 : i64, scratch_operands = 0 : i64, tpu.core_type = #tpu.core_type<tc>} {
    %c0 = arith.constant 0 : index
    %c0_0 = arith.constant 0 : index
    %0 = vector.load %arg0[%c0, %c0_0] : memref<64x4xf32, #tpu.memory_space<vmem>>, vector<64x4xf32>
    %1 = arith.truncf %0 : vector<64x4xf32> to vector<64x4xbf16>
    %c0_1 = arith.constant 0 : index
    %c0_2 = arith.constant 0 : index
    %2 = vector.load %arg1[%c0_1, %c0_2] : memref<4x256xbf16, #tpu.memory_space<vmem>>, vector<4x256xbf16>
    %cst = arith.constant dense<0.000000e+00> : vector<64x256xf32>
    %3 = tpu.matmul %1, %2, %cst {dimension_numbers = #tpu.dot_dimension_numbers<[1], [0], [0], [1], [0, 0, 1, 1], [], []>} : vector<64x4xbf16>, vector<4x256xbf16>, vector<64x256xf32> -> vector<64x256xf32>
    %c0_3 = arith.constant 0 : index
    %c0_4 = arith.constant 0 : index
    %4 = vector.load %arg2[%c0_3, %c0_4] : memref<1x256xf32, #tpu.memory_space<vmem>>, vector<1x256xf32>
    %5 = vector.broadcast %4 : vector<1x256xf32> to vector<64x256xf32>
    %6 = arith.addf %3, %5 : vector<64x256xf32>
    %cst_5 = arith.constant 0.000000e+00 : f32
    %7 = vector.broadcast %cst_5 : f32 to vector<64x256xf32>
    %8 = arith.maximumf %6, %7 : vector<64x256xf32>
    %9 = arith.truncf %8 : vector<64x256xf32> to vector<64x256xbf16>
    %c0_6 = arith.constant 0 : index
    %c0_7 = arith.constant 0 : index
    %10 = vector.load %arg3[%c0_6, %c0_7] : memref<256x256xbf16, #tpu.memory_space<vmem>>, vector<256x256xbf16>
    %cst_8 = arith.constant dense<0.000000e+00> : vector<64x256xf32>
    %11 = tpu.matmul %9, %10, %cst_8 {dimension_numbers = #tpu.dot_dimension_numbers<[1], [0], [0], [1], [0, 0, 1, 1], [], []>} : vector<64x256xbf16>, vector<256x256xbf16>, vector<64x256xf32> -> vector<64x256xf32>
    %c0_9 = arith.constant 0 : index
    %c0_10 = arith.constant 0 : index
    %12 = vector.load %arg4[%c0_9, %c0_10] : memref<1x256xf32, #tpu.memory_space<vmem>>, vector<1x256xf32>
    %13 = vector.broadcast %12 : vector<1x256xf32> to vector<64x256xf32>
    %14 = arith.addf %11, %13 : vector<64x256xf32>
    %cst_11 = arith.constant 0.000000e+00 : f32
    %15 = vector.broadcast %cst_11 : f32 to vector<64x256xf32>
    %16 = arith.maximumf %14, %15 : vector<64x256xf32>
    %17 = arith.truncf %16 : vector<64x256xf32> to vector<64x256xbf16>
    %c0_12 = arith.constant 0 : index
    %c0_13 = arith.constant 0 : index
    %18 = vector.load %arg5[%c0_12, %c0_13] : memref<256x128xbf16, #tpu.memory_space<vmem>>, vector<256x128xbf16>
    %cst_14 = arith.constant dense<0.000000e+00> : vector<64x128xf32>
    %19 = tpu.matmul %17, %18, %cst_14 {dimension_numbers = #tpu.dot_dimension_numbers<[1], [0], [0], [1], [0, 0, 1, 1], [], []>} : vector<64x256xbf16>, vector<256x128xbf16>, vector<64x128xf32> -> vector<64x128xf32>
    %c0_15 = arith.constant 0 : index
    %c0_16 = arith.constant 0 : index
    %20 = vector.load %arg6[%c0_15, %c0_16] : memref<1x128xf32, #tpu.memory_space<vmem>>, vector<1x128xf32>
    %21 = vector.broadcast %20 : vector<1x128xf32> to vector<64x128xf32>
    %22 = arith.addf %19, %21 : vector<64x128xf32>
    %cst_17 = arith.constant 0.000000e+00 : f32
    %23 = vector.broadcast %cst_17 : f32 to vector<64x128xf32>
    %24 = arith.maximumf %22, %23 : vector<64x128xf32>
    %25 = arith.truncf %24 : vector<64x128xf32> to vector<64x128xbf16>
    %c0_18 = arith.constant 0 : index
    %c0_19 = arith.constant 0 : index
    %26 = vector.load %arg7[%c0_18, %c0_19] : memref<128x5xbf16, #tpu.memory_space<vmem>>, vector<128x5xbf16>
    %cst_20 = arith.constant dense<0.000000e+00> : vector<64x5xf32>
    %27 = tpu.matmul %25, %26, %cst_20 {dimension_numbers = #tpu.dot_dimension_numbers<[1], [0], [0], [1], [0, 0, 1, 1], [], []>} : vector<64x128xbf16>, vector<128x5xbf16>, vector<64x5xf32> -> vector<64x5xf32>
    %c0_21 = arith.constant 0 : index
    %c0_22 = arith.constant 0 : index
    %28 = vector.load %arg8[%c0_21, %c0_22] : memref<1x5xf32, #tpu.memory_space<vmem>>, vector<1x5xf32>
    %29 = vector.broadcast %28 : vector<1x5xf32> to vector<64x5xf32>
    %30 = arith.addf %27, %29 : vector<64x5xf32>
    %c0_23 = arith.constant 0 : index
    %c0_24 = arith.constant 0 : index
    %31 = vector.load %arg9[%c0_23, %c0_24] : memref<64x5xf32, #tpu.memory_space<vmem>>, vector<64x5xf32>
    tpu.vector_store %arg9[%c0_23, %c0_24], %30 {strides = array<i32>} : memref<64x5xf32, #tpu.memory_space<vmem>>, vector<64x5xf32>,
    return
  }
}

</mosaic_0001>

<bundles_post_ra>
// kernel: qlearning_forward.1
= control target key start
LH: loop header
LB: loop body
LE: loop exit
PB: predicated region body
PF: predicated region fallthrough
CT: control target
= control target key end

     0   :  { %14 = vsyncpa [#allocation3], 0  ;;  %s1101_s30 = smov [#allocation2]   ;;  %s1336_s0 = inlined_call_operand.vmem [shape: f32[64,4], index: 0, kind: input, shape index: {}]   ;;  %s1337_s1 = inlined_call_operand.vmem [shape: bf16[4,256], index: 1, kind: input, shape index: {}]   ;;  %s1338_s2 = inlined_call_operand.vmem [shape: f32[1,256], index: 2, kind: input, shape index: {}]   ;;  %s1339_s3 = inlined_call_operand.hbm [shape: bf16[256,256], index: 3, kind: input, shape index: {}]   ;;  %s1340_s4 = inlined_call_operand.vmem [shape: f32[1,256], index: 4, kind: input, shape index: {}]   ;;  %s1341_s5 = inlined_call_operand.vmem [shape: bf16[256,128], index: 5, kind: input, shape index: {}]   ;;  %s1342_s6 = inlined_call_operand.vmem [shape: f32[1,128], index: 6, kind: input, shape index: {}]   ;;  %s1343_s7 = inlined_call_operand.vmem [shape: bf16[128,5], index: 7, kind: input, shape index: {}]   ;;  %s1344_s8 = inlined_call_operand.vmem [shape: f32[1,5], index: 8, kind: input, shape index: {}]   ;;  %s1345_s9 = inlined_call_operand.vmem [shape: f32[64,5], index: 9, kind: output, shape index: {}]  }
   0x1   :  { %s26_s10 = sshll.u32 %s1101_s30, 4  ;;  %s1077_s13 = scalar_lea.hbm %s1339_s3, 4096  ;;  %s27_s10 = int_to_ptr.vmem [resolvable:$true] %s26_s10 }
   0x2   :  { %p1078_p0 = scmp.ne.s32.totalorder %s1339_s3, %s1077_s13  ;;  %p1081_p1 = scmp.lt.u32.totalorder %s1077_s13, %s1339_s3 }
   0x4   :  { %p1083_p2 = pnand %p1081_p1, %p1078_p0 }
   0x6   :  { %1086 = shalt.err (!%p1083_p2)
}
   0x7   :  { %s1087_s18 = scalar_lea.vmem %s27_s10, 4096  ;;  %p1092_p4 = scmp.lt.s32.totalorder %s27_s10, %s27_s10 }
   0x8   :  { %p1088_p3 = scmp.ne.s32.totalorder %s27_s10, %s1087_s18  ;;  %p1093_p5 = scmp.lt.s32.totalorder %s1087_s18, %s1087_s18 }
   0xa   :  { %p1094_p6 = por %p1093_p5, %p1092_p4 }
   0xc   :  { %p1095_p7 = pnand %p1094_p6, %p1088_p3 }
   0xe   :  { %1098 = shalt.err (!%p1095_p7)
}
   0xf   :  { %s1102_s19 = smov 128   ;;  %s1103_s20 = smov 8  }
  0x10   :  { %32 = dma.hbm_to_vmem [thread:$0]  %s1339_s3, 4096, %s27_s10, [#allocation3], %s1102_s19, %s1102_s19, %s1103_s20  }
  0x11   :  { %1099 = dma.done.wait [#allocation3], 4096  }
  0x12   :  { %1100 = vsyncadd [#allocation3], 4294963200  ;;  %v1104_v0 = vmov 0   ;;  %vm94_vm0 = vcmask 1041408   ;;  %v47_v2 = vld [vmem:[%s1336_s0] sm:$0xff]  ;;  %v48_v3 = vld [vmem:[%s1336_s0 + $0x8] sm:$0xff]  ;;  %v62_v60 = vlaneseq }
  0x13   :  { %133 = vmatprep.mubr.bf16.mxu0 %v1104_v0  ;;  %v861_v1 = vld.sshfl [vmem:[%s1337_s1] sm:$0x33 pattern:$0x76325410]  ;;  %v55_v6 = vpack.c.bf16 %v48_v3, %v47_v2  ;;  %v1005_v7 = vld [vmem:[#allocation2 + $0x4] ss:$8 sps:$4 sm:$0xff]  }
  0x14   :  { %v80_v4 = vcombine.high %v861_v1, %v861_v1  ;;  %v96_v5 = vsel %vm94_vm0, %v861_v1, 0  ;;  %vm81_vm1 = vcmask 31744   ;;  %v1007_v8 = vld [vmem:[#allocation2] ss:$8 sps:$4 sm:$0xff]   ;;  %402 = vmatprep.subr.bf16.mxu1 %v1005_v7  ;;  %v1008_v9 = vld [vmem:[#allocation2 + $0x14] ss:$8 sps:$4 sm:$0xff]  }
  0x15   :  { %v49_v10 = vld [vmem:[%s1336_s0 + $0x10] sm:$0xff]  ;;  %403 = vmatpush1.bf16.msra.mxu1 %v1007_v8  ;;  %v1011_v12 = vld [vmem:[#allocation2 + $0x24] ss:$8 sps:$4 sm:$0xff]   ;;  %v50_v13 = vld [vmem:[%s1336_s0 + $0x18] sm:$0xff]  ;;  %v1234_v61 = vshrl.u32 %v62_v60, 7  ;;  %vm847_vm2 = vcmask 39936  }
  0x16   :  { %862 = vmatprep.subr.msk.bf16.mxu0 %vm94_vm0, %v80_v4  ;;  %v1010_v11 = vld [vmem:[#allocation2 + $0x10] ss:$8 sps:$4 sm:$0xff]   ;;  %404 = vmatprep.subr.bf16.mxu1 %v1008_v9  ;;  %v1013_v14 = vld [vmem:[#allocation2 + $0x20] ss:$8 sps:$4 sm:$0xff]   ;;  %v56_v15 = vpack.c.bf16 %v50_v13, %v49_v10  ;;  %v1014_v16 = vld [vmem:[#allocation2 + $0x34] ss:$8 sps:$4 sm:$0xff]  }
  0x17   :  { %102 = vmatpush1.bf16.msra.mxu0 %v96_v5  ;;  %v51_v17 = vld [vmem:[%s1336_s0 + $0x20] sm:$0xff]  ;;  %v1016_v18 = vld [vmem:[#allocation2 + $0x30] ss:$8 sps:$4 sm:$0xff]   ;;  %v52_v20 = vld [vmem:[%s1336_s0 + $0x28] sm:$0xff]  ;;  %v64_v62 = vsub.s32 0, %v1234_v61 }
  0x18   :  { %v1017_v19 = vld [vmem:[#allocation2 + $0x44] ss:$8 sps:$4 sm:$0xff]   ;;  %v1019_v21 = vld [vmem:[#allocation2 + $0x40] ss:$8 sps:$4 sm:$0xff]   ;;  %v57_v22 = vpack.c.bf16 %v52_v20, %v51_v17  ;;  %v1020_v23 = vld [vmem:[#allocation2 + $0x54] ss:$8 sps:$4 sm:$0xff]  }
  0x19   :  { %405 = vmatpush1.bf16.msra.mxu1 %v1010_v11  ;;  %v1022_v24 = vld [vmem:[#allocation2 + $0x50] ss:$8 sps:$4 sm:$0xff]   ;;  %v1023_v25 = vld [vmem:[#allocation2 + $0x64] ss:$8 sps:$4 sm:$0xff]   ;;  %v1025_v28 = vld [vmem:[#allocation2 + $0x60] ss:$8 sps:$4 sm:$0xff]  }
  0x1a   :  { %863 = vmatmul.mubr.msk.bf16.vlgmr.msra.gmra.mrb[0].mxu0 %vm81_vm1, %v55_v6  ;;  %406 = vmatprep.subr.bf16.mxu1 %v1011_v12  ;;  %v53_v26 = vld [vmem:[%s1336_s0 + $0x30] sm:$0xff]  ;;  %v54_v27 = vld [vmem:[%s1336_s0 + $0x38] sm:$0xff]  ;;  %v1029_v32 = vld [vmem:[#allocation2 + $0x84] ss:$8 sps:$4 sm:$0xff]  }
  0x1b   :  { %143 = vmatprep.mubr.bf16.mxu0 %v1104_v0  ;;  %v1026_v29 = vld [vmem:[#allocation2 + $0x74] ss:$8 sps:$4 sm:$0xff]   ;;  %v58_v30 = vpack.c.bf16 %v54_v27, %v53_v26  ;;  %v1028_v31 = vld [vmem:[#allocation2 + $0x70] ss:$8 sps:$4 sm:$0xff]   ;;  %v1031_v33 = vld [vmem:[#allocation2 + $0x80] ss:$8 sps:$4 sm:$0xff]  }
  0x1c   :  { %v1032_v34 = vld [vmem:[#allocation2 + $0x94] ss:$8 sps:$4 sm:$0xff]   ;;  %v1034_v35 = vld [vmem:[#allocation2 + $0x90] ss:$8 sps:$4 sm:$0xff]   ;;  %v1035_v36 = vld [vmem:[#allocation2 + $0xa4] ss:$8 sps:$4 sm:$0xff]  }
  0x1d   :  { %407 = vmatpush1.bf16.msra.mxu1 %v1013_v14  ;;  %v1037_v37 = vld [vmem:[#allocation2 + $0xa0] ss:$8 sps:$4 sm:$0xff]   ;;  %v1038_v38 = vld [vmem:[#allocation2 + $0xb4] ss:$8 sps:$4 sm:$0xff]   ;;  %v1040_v39 = vld [vmem:[#allocation2 + $0xb0] ss:$8 sps:$4 sm:$0xff]  }
  0x1e   :  { %408 = vmatprep.subr.bf16.mxu1 %v1014_v16  ;;  %v1041_v40 = vld [vmem:[#allocation2 + $0xc4] ss:$8 sps:$4 sm:$0xff]   ;;  %v1043_v41 = vld [vmem:[#allocation2 + $0xc0] ss:$8 sps:$4 sm:$0xff]   ;;  %v1044_v42 = vld [vmem:[#allocation2 + $0xd4] ss:$8 sps:$4 sm:$0xff]  }
  0x1f   :  { %v1046_v43 = vld [vmem:[#allocation2 + $0xd0] ss:$8 sps:$4 sm:$0xff]   ;;  %v1047_v44 = vld [vmem:[#allocation2 + $0xe4] ss:$8 sps:$4 sm:$0xff]   ;;  %v1049_v45 = vld [vmem:[#allocation2 + $0xe0] ss:$8 sps:$4 sm:$0xff]  }
  0x20   :  { %v1050_v46 = vld [vmem:[#allocation2 + $0xf4] ss:$8 sps:$4 sm:$0xff]   ;;  %v1052_v47 = vld [vmem:[#allocation2 + $0xf0] ss:$8 sps:$4 sm:$0xff]   ;;  %v1053_v48 = vld [vmem:[%s1341_s5 + $0x40] sm:$0xff]  }
  0x21   :  { %409 = vmatpush1.bf16.msra.mxu1 %v1016_v18  ;;  %v1054_v49 = vld [vmem:[%s1341_s5] sm:$0xff]   ;;  %v1055_v50 = vld [vmem:[%s1341_s5 + $0x48] sm:$0xff]   ;;  %925 = vmatprep.subr.bf16.mxu0 %v1053_v48  ;;  %v1057_v52 = vld [vmem:[%s1341_s5 + $0x50] sm:$0xff]  }
  0x22   :  { %864 = vmatmul.mubr.msk.bf16.gmra.mrb[4].mxu0 %vm81_vm1, %v56_v15  ;;  %410 = vmatprep.subr.bf16.mxu1 %v1017_v19  ;;  %v1056_v51 = vld [vmem:[%s1341_s5 + $0x8] sm:$0xff]   ;;  %v1058_v53 = vld [vmem:[%s1341_s5 + $0x10] sm:$0xff]   ;;  %v1059_v54 = vld [vmem:[%s1341_s5 + $0x58] sm:$0xff]  }
  0x23   :  { %153 = vmatprep.mubr.bf16.mxu0 %v1104_v0  ;;  %926 = vmatpush3.bf16.msra.mxu0 %v1054_v49  ;;  %v1060_v55 = vld [vmem:[%s1341_s5 + $0x18] sm:$0xff]   ;;  %v1061_v56 = vld [vmem:[%s1341_s5 + $0x60] sm:$0xff]   ;;  %v1063_v58 = vld [vmem:[%s1341_s5 + $0x68] sm:$0xff]  }
  0x24   :  { %927 = vmatprep.subr.bf16.mxu0 %v1055_v50  ;;  %v1062_v57 = vld [vmem:[%s1341_s5 + $0x20] sm:$0xff]   ;;  %v1064_v59 = vld [vmem:[%s1341_s5 + $0x28] sm:$0xff]   ;;  %v1066_v60 = vld [vmem:[%s1341_s5 + $0x30] sm:$0xff]  }
  0x25   :  { %411 = vmatpush1.bf16.msra.mxu1 %v1019_v21  ;;  %v60_v63 = vld [vmem:[%s1338_s2] sm:$0x3] }
  0x26   :  { %412 = vmatprep.subr.bf16.mxu1 %v1020_v23  ;;  %v65_v1 = vrot.slane %v60_v63, %v64_v62 }
  0x27   :  { %928 = vmatpush3.bf16.msra.mxu0 %v1056_v51 }
  0x28   :  { %929 = vmatprep.subr.bf16.mxu0 %v1057_v52 }
  0x29   :  { %413 = vmatpush1.bf16.msra.mxu1 %v1022_v24 }
  0x2a   :  { %865 = vmatmul.mubr.msk.bf16.gmra.mrb[8].mxu0 %vm81_vm1, %v57_v22  ;;  %414 = vmatprep.subr.bf16.mxu1 %v1023_v25 }
  0x2b   :  { %163 = vmatprep.mubr.bf16.mxu0 %v1104_v0  ;;  %930 = vmatpush3.bf16.msra.mxu0 %v1058_v53  ;;  %v68_v0 = vsub.s32 1, %v1234_v61 }
  0x2c   :  { %931 = vmatprep.subr.bf16.mxu0 %v1059_v54 }
  0x2d   :  { %415 = vmatpush1.bf16.msra.mxu1 %v1025_v28  ;;  %v69_v2 = vrot.slane %v60_v63, %v68_v0  ;;  %v1067_v63 = vld [vmem:[%s1341_s5 + $0x78] sm:$0xff]  }
  0x2e   :  { %416 = vmatprep.subr.bf16.mxu1 %v1026_v29 }
  0x2f   :  { %932 = vmatpush3.bf16.msra.mxu0 %v1060_v55 }
  0x30   :  { %933 = vmatprep.subr.bf16.mxu0 %v1061_v56 }
  0x31   :  { %417 = vmatpush1.bf16.msra.mxu1 %v1028_v31 }
  0x32   :  { %866 = vmatmul.mubr.msk.bf16.gmra.mrb[12].mxu0 %vm81_vm1, %v58_v30  ;;  %418 = vmatprep.subr.bf16.mxu1 %v1029_v32 }
  0x33   :  { %934 = vmatpush3.bf16.msra.mxu0 %v1062_v57 }
  0x34   :  { %935 = vmatprep.subr.bf16.mxu0 %v1063_v58 }
  0x35   :  { %419 = vmatpush1.bf16.msra.mxu1 %v1031_v33 }
  0x36   :  { %420 = vmatprep.subr.bf16.mxu1 %v1032_v34 }
  0x37   :  { %936 = vmatpush3.bf16.msra.mxu0 %v1064_v59  ;;  %v1065_v59 = vld [vmem:[%s1341_s5 + $0x70] sm:$0xff]  }
  0x38   :  { %937 = vmatprep.subr.bf16.mxu0 %v1065_v59 }
  0x39   :  { %421 = vmatpush1.bf16.msra.mxu1 %v1034_v35 }
  0x3a   :  { %422 = vmatprep.subr.bf16.mxu1 %v1035_v36 }
  0x3b   :  { %938 = vmatpush3.bf16.msra.mxu0 %v1066_v60 }
  0x3c   :  { %939 = vmatprep.subr.bf16.mxu0 %v1067_v63  ;;  %v1072_v63 = vld [vmem:[%s1343_s7 + $0x18] sm:$0xff]  }
  0x3d   :  { %423 = vmatpush1.bf16.msra.mxu1 %v1037_v37 }
  0x3e   :  { %424 = vmatprep.subr.bf16.mxu1 %v1038_v38 }
  0x41   :  { %425 = vmatpush1.bf16.msra.mxu1 %v1040_v39 }
  0x42   :  { %426 = vmatprep.subr.bf16.mxu1 %v1041_v40 }
  0x45   :  { %427 = vmatpush1.bf16.msra.mxu1 %v1043_v41 }
  0x46   :  { %428 = vmatprep.subr.bf16.mxu1 %v1044_v42 }
  0x49   :  { %429 = vmatpush1.bf16.msra.mxu1 %v1046_v43 }
  0x4a   :  { %430 = vmatprep.subr.bf16.mxu1 %v1047_v44 }
  0x4d   :  { %431 = vmatpush1.bf16.msra.mxu1 %v1049_v45 }
  0x4e   :  { %432 = vmatprep.subr.bf16.mxu1 %v1050_v46 }
  0x51   :  { %433 = vmatpush1.bf16.msra.mxu1 %v1052_v47 }
  0xed   :  { %v135_v3 = vpop.f32.mrb[0].mxu0 }
  0xee   :  { %v136_v4 = vadd.f32 %v135_v3, %v65_v1  ;;  %v137_v5 = vpop.f32.mrb[1].mxu0  ;;  %v230_v3 = vld [vmem:[%s1340_s4] sm:$0x3] }
  0xef   :  { %v138_v6 = vadd.f32 %v137_v5, %v69_v2  ;;  %v139_v7 = vpop.f32.mrb[2].mxu0  ;;  %v1267_v5 = vrot.slane %v230_v3, %v68_v0 }
  0xf0   :  { %v140_v8 = vadd.f32 %v139_v7, %v65_v1  ;;  %v141_v9 = vpop.f32.mrb[3].mxu0  ;;  %v174_v11 = vmax.f32 %v136_v4, 0.0  ;;  %v235_v4 = vrot.slane %v230_v3, %v64_v62  ;;  %v1075_v3 = vld [vmem:[%s1343_s7 + $0x30] sm:$0xff]  }
  0xf1   :  { %v142_v10 = vadd.f32 %v141_v9, %v69_v2  ;;  %v175_v13 = vmax.f32 %v138_v6, 0.0 }
  0xf2   :  { %v176_v12 = vmax.f32 %v140_v8, 0.0 }
  0xf3   :  { %v177_v14 = vmax.f32 %v142_v10, 0.0 }
  0xf4   :  { %v190_v15 = vpack.c.bf16 %v176_v12, %v174_v11 }
  0xf5   :  { %v145_v16 = vpop.f32.mrb[4].mxu0  ;;  %v191_v17 = vpack.c.bf16 %v177_v14, %v175_v13 }
  0xf6   :  { %v146_v18 = vadd.f32 %v145_v16, %v65_v1  ;;  %v147_v19 = vpop.f32.mrb[5].mxu0 }
  0xf7   :  { %v148_v20 = vadd.f32 %v147_v19, %v69_v2  ;;  %v149_v21 = vpop.f32.mrb[6].mxu0  ;;  %434 = vmatprep.mubr.bf16.mxu1 %v191_v17 }
  0xf8   :  { %v150_v22 = vadd.f32 %v149_v21, %v65_v1  ;;  %v151_v23 = vpop.f32.mrb[7].mxu0  ;;  %435 = vmatmul.mubr.bf16.vlgmr.msra.gmra.mrb[0].mxu1 %v190_v15  ;;  %v178_v25 = vmax.f32 %v146_v18, 0.0 }
  0xf9   :  { %v152_v24 = vadd.f32 %v151_v23, %v69_v2  ;;  %v179_v27 = vmax.f32 %v148_v20, 0.0  ;;  %v1070_v20 = vld [vmem:[%s1343_s7 + $0x8] sm:$0xff]  }
  0xfa   :  { %v180_v26 = vmax.f32 %v150_v22, 0.0 }
  0xfb   :  { %v181_v28 = vmax.f32 %v152_v24, 0.0 }
  0xfc   :  { %v192_v29 = vpack.c.bf16 %v180_v26, %v178_v25 }
  0xfd   :  { %v193_v30 = vpack.c.bf16 %v181_v28, %v179_v27  ;;  %v155_v31 = vpop.f32.mrb[8].mxu0  ;;  %v1071_v28 = vld [vmem:[%s1343_s7 + $0x10] sm:$0xff]  }
  0xfe   :  { %v156_v32 = vadd.f32 %v155_v31, %v65_v1  ;;  %v157_v33 = vpop.f32.mrb[9].mxu0 }
  0xff   :  { %v158_v34 = vadd.f32 %v157_v33, %v69_v2  ;;  %v159_v35 = vpop.f32.mrb[10].mxu0  ;;  %444 = vmatprep.mubr.bf16.mxu1 %v193_v30 }
 0x100   :  { %v160_v36 = vadd.f32 %v159_v35, %v65_v1  ;;  %v161_v37 = vpop.f32.mrb[11].mxu0  ;;  %445 = vmatmul.mubr.bf16.gmra.mrb[4].mxu1 %v192_v29  ;;  %v182_v39 = vmax.f32 %v156_v32, 0.0 }
 0x101   :  { %v162_v38 = vadd.f32 %v161_v37, %v69_v2  ;;  %v183_v41 = vmax.f32 %v158_v34, 0.0 }
 0x102   :  { %v184_v40 = vmax.f32 %v160_v36, 0.0 }
 0x103   :  { %v185_v42 = vmax.f32 %v162_v38, 0.0 }
 0x104   :  { %v194_v43 = vpack.c.bf16 %v184_v40, %v182_v39 }
 0x105   :  { %v195_v44 = vpack.c.bf16 %v185_v42, %v183_v41  ;;  %v165_v45 = vpop.f32.mrb[12].mxu0 }
 0x106   :  { %v166_v46 = vadd.f32 %v165_v45, %v65_v1  ;;  %v167_v47 = vpop.f32.mrb[13].mxu0 }
 0x107   :  { %v168_v48 = vadd.f32 %v167_v47, %v69_v2  ;;  %v169_v49 = vpop.f32.mrb[14].mxu0  ;;  %454 = vmatprep.mubr.bf16.mxu1 %v195_v44 }
 0x108   :  { %v170_v50 = vadd.f32 %v169_v49, %v65_v1  ;;  %v171_v51 = vpop.f32.mrb[15].mxu0  ;;  %455 = vmatmul.mubr.bf16.gmra.mrb[8].mxu1 %v194_v43  ;;  %v186_v53 = vmax.f32 %v166_v46, 0.0  ;;  %v1068_v1 = vld [vmem:[%s1341_s5 + $0x38] sm:$0xff]  }
 0x109   :  { %v172_v52 = vadd.f32 %v171_v51, %v69_v2  ;;  %v187_v55 = vmax.f32 %v168_v48, 0.0  ;;  %940 = vmatpush3.bf16.msra.mxu0 %v1068_v1  ;;  %v1069_v2 = vld [vmem:[%s1343_s7] sm:$0xff]  }
 0x10a   :  { %v188_v54 = vmax.f32 %v170_v50, 0.0  ;;  %977 = vmatprep.subr.bf16.mxu0 %v1069_v2  ;;  %v1073_v1 = vld [vmem:[%s1343_s7 + $0x20] sm:$0xff]  }
 0x10b   :  { %v189_v56 = vmax.f32 %v172_v52, 0.0 }
 0x10c   :  { %v196_v57 = vpack.c.bf16 %v188_v54, %v186_v53 }
 0x10d   :  { %v197_v58 = vpack.c.bf16 %v189_v56, %v187_v55 }
 0x10f   :  { %464 = vmatprep.mubr.bf16.mxu1 %v197_v58 }
 0x110   :  { %465 = vmatmul.mubr.bf16.gmra.mrb[12].mxu1 %v196_v57 }
 0x1cb   :  { %v436_v6 = vpop.f32.mrb[0].mxu1 }
 0x1cc   :  { %v437_v7 = vadd.f32 %v436_v6, %v235_v4  ;;  %v438_v8 = vpop.f32.mrb[1].mxu1  ;;  %v899_v6 = vld [vmem:[%s1342_s6] ss:$0 sm:$0xff] }
 0x1cd   :  { %v439_v9 = vadd.f32 %v438_v8, %v1267_v5  ;;  %v440_v10 = vpop.f32.mrb[2].mxu1 }
 0x1ce   :  { %v441_v11 = vadd.f32 %v440_v10, %v235_v4  ;;  %v442_v12 = vpop.f32.mrb[3].mxu1  ;;  %v475_v14 = vmax.f32 %v437_v7, 0.0 }
 0x1cf   :  { %v443_v13 = vadd.f32 %v442_v12, %v1267_v5  ;;  %v476_v16 = vmax.f32 %v439_v9, 0.0 }
 0x1d0   :  { %v477_v15 = vmax.f32 %v441_v11, 0.0 }
 0x1d1   :  { %v478_v17 = vmax.f32 %v443_v13, 0.0 }
 0x1d2   :  { %v491_v18 = vpack.c.bf16 %v477_v15, %v475_v14 }
 0x1d3   :  { %v492_v62 = vpack.c.bf16 %v478_v17, %v476_v16  ;;  %v446_v19 = vpop.f32.mrb[4].mxu1 }
 0x1d4   :  { %v447_v61 = vadd.f32 %v446_v19, %v235_v4  ;;  %v448_v0 = vpop.f32.mrb[5].mxu1 }
 0x1d5   :  { %v449_v21 = vadd.f32 %v448_v0, %v1267_v5  ;;  %v450_v22 = vpop.f32.mrb[6].mxu1  ;;  %666 = vmatprep.mubr.bf16.mxu0 %v492_v62 }
 0x1d6   :  { %v451_v23 = vadd.f32 %v450_v22, %v235_v4  ;;  %v452_v24 = vpop.f32.mrb[7].mxu1  ;;  %667 = vmatmul.mubr.bf16.vlgmr.msra.gmra.mrb[16].mxu0 %v491_v18  ;;  %v479_v26 = vmax.f32 %v447_v61, 0.0 }
 0x1d7   :  { %v453_v25 = vadd.f32 %v452_v24, %v1267_v5  ;;  %978 = vmatpush3.bf16.msra.mxu0 %v1069_v2  ;;  %v480_v29 = vmax.f32 %v449_v21, 0.0  ;;  %v1074_v2 = vld [vmem:[%s1343_s7 + $0x28] sm:$0xff]  }
 0x1d8   :  { %v481_v27 = vmax.f32 %v451_v23, 0.0  ;;  %979 = vmatprep.subr.bf16.mxu0 %v1070_v20 }
 0x1d9   :  { %v482_v30 = vmax.f32 %v453_v25, 0.0 }
 0x1da   :  { %v493_v31 = vpack.c.bf16 %v481_v27, %v479_v26 }
 0x1db   :  { %v494_v32 = vpack.c.bf16 %v482_v30, %v480_v29  ;;  %v456_v33 = vpop.f32.mrb[8].mxu1  ;;  %980 = vmatpush3.bf16.msra.mxu0 %v1070_v20 }
 0x1dc   :  { %v457_v34 = vadd.f32 %v456_v33, %v235_v4  ;;  %v458_v35 = vpop.f32.mrb[9].mxu1  ;;  %981 = vmatprep.subr.bf16.mxu0 %v1071_v28 }
 0x1dd   :  { %v459_v36 = vadd.f32 %v458_v35, %v1267_v5  ;;  %v460_v37 = vpop.f32.mrb[10].mxu1  ;;  %674 = vmatprep.mubr.bf16.mxu0 %v494_v32 }
 0x1de   :  { %v461_v38 = vadd.f32 %v460_v37, %v235_v4  ;;  %v462_v39 = vpop.f32.mrb[11].mxu1  ;;  %675 = vmatmul.mubr.bf16.gmra.mrb[20].mxu0 %v493_v31  ;;  %v483_v41 = vmax.f32 %v457_v34, 0.0 }
 0x1df   :  { %v463_v40 = vadd.f32 %v462_v39, %v1267_v5  ;;  %982 = vmatpush3.bf16.msra.mxu0 %v1071_v28  ;;  %v484_v43 = vmax.f32 %v459_v36, 0.0 }
 0x1e0   :  { %v485_v42 = vmax.f32 %v461_v38, 0.0  ;;  %983 = vmatprep.subr.bf16.mxu0 %v1072_v63 }
 0x1e1   :  { %v486_v44 = vmax.f32 %v463_v40, 0.0 }
 0x1e2   :  { %v495_v45 = vpack.c.bf16 %v485_v42, %v483_v41 }
 0x1e3   :  { %v496_v46 = vpack.c.bf16 %v486_v44, %v484_v43  ;;  %v466_v47 = vpop.f32.mrb[12].mxu1  ;;  %984 = vmatpush3.bf16.msra.mxu0 %v1072_v63 }
 0x1e4   :  { %v467_v48 = vadd.f32 %v466_v47, %v235_v4  ;;  %v468_v49 = vpop.f32.mrb[13].mxu1  ;;  %985 = vmatprep.subr.bf16.mxu0 %v1073_v1  ;;  %v916_v47 = vld [vmem:[%s1344_s8] ss:$0 sm:$0xff] }
 0x1e5   :  { %v469_v50 = vadd.f32 %v468_v49, %v1267_v5  ;;  %v470_v51 = vpop.f32.mrb[14].mxu1  ;;  %682 = vmatprep.mubr.bf16.mxu0 %v496_v46 }
 0x1e6   :  { %v471_v52 = vadd.f32 %v470_v51, %v235_v4  ;;  %v472_v53 = vpop.f32.mrb[15].mxu1  ;;  %683 = vmatmul.mubr.bf16.gmra.mrb[24].mxu0 %v495_v45  ;;  %v487_v55 = vmax.f32 %v467_v48, 0.0  ;;  %v1076_v4 = vld [vmem:[%s1343_s7 + $0x38] sm:$0xff]  }
 0x1e7   :  { %v473_v54 = vadd.f32 %v472_v53, %v1267_v5  ;;  %v488_v57 = vmax.f32 %v469_v50, 0.0  ;;  %986 = vmatpush3.bf16.msra.mxu0 %v1073_v1 }
 0x1e8   :  { %v489_v56 = vmax.f32 %v471_v52, 0.0  ;;  %987 = vmatprep.subr.bf16.mxu0 %v1074_v2 }
 0x1e9   :  { %v490_v58 = vmax.f32 %v473_v54, 0.0 }
 0x1ea   :  { %v497_v59 = vpack.c.bf16 %v489_v56, %v487_v55 }
 0x1eb   :  { %v498_v60 = vpack.c.bf16 %v490_v58, %v488_v57  ;;  %988 = vmatpush3.bf16.msra.mxu0 %v1074_v2 }
 0x1ec   :  { %989 = vmatprep.subr.bf16.mxu0 %v1075_v3 }
 0x1ed   :  { %690 = vmatprep.mubr.bf16.mxu0 %v498_v60 }
 0x1ee   :  { %691 = vmatmul.mubr.bf16.gmra.mrb[28].mxu0 %v497_v59 }
 0x1ef   :  { %990 = vmatpush3.bf16.msra.mxu0 %v1075_v3 }
 0x1f0   :  { %991 = vmatprep.subr.bf16.mxu0 %v1076_v4 }
 0x1f3   :  { %992 = vmatpush3.bf16.msra.mxu0 %v1076_v4 }
 0x2a9   :  { %v941_v5 = vpop.f32.mrb[16].mxu0 }
 0x2aa   :  { %v942_v7 = vpop.f32.mrb[17].mxu0 }
 0x2ab   :  { %v943_v8 = vadd.f32 %v942_v7, %v941_v5  ;;  %v944_v9 = vpop.f32.mrb[18].mxu0 }
 0x2ac   :  { %v945_v10 = vpop.f32.mrb[19].mxu0 }
 0x2ad   :  { %v669_v11 = vadd.f32 %v943_v8, %v899_v6  ;;  %v946_v12 = vadd.f32 %v945_v10, %v944_v9 }
 0x2af   :  { %v672_v13 = vadd.f32 %v946_v12, %v899_v6  ;;  %v699_v14 = vmax.f32 %v669_v11, 0.0 }
 0x2b1   :  { %v700_v15 = vmax.f32 %v672_v13, 0.0  ;;  %v947_v16 = vpop.f32.mrb[20].mxu0 }
 0x2b2   :  { %v948_v17 = vpop.f32.mrb[21].mxu0 }
 0x2b3   :  { %v949_v18 = vadd.f32 %v948_v17, %v947_v16  ;;  %v950_v62 = vpop.f32.mrb[22].mxu0  ;;  %v707_v19 = vpack.c.bf16 %v700_v15, %v699_v14 }
 0x2b4   :  { %v951_v61 = vpop.f32.mrb[23].mxu0 }
 0x2b5   :  { %v677_v0 = vadd.f32 %v949_v18, %v899_v6  ;;  %v952_v20 = vadd.f32 %v951_v61, %v950_v62  ;;  %993 = vmatprep.mubr.bf16.mxu0 %v707_v19 }
 0x2b7   :  { %v680_v21 = vadd.f32 %v952_v20, %v899_v6  ;;  %v701_v22 = vmax.f32 %v677_v0, 0.0 }
 0x2b9   :  { %v702_v23 = vmax.f32 %v680_v21, 0.0  ;;  %v953_v24 = vpop.f32.mrb[24].mxu0 }
 0x2ba   :  { %v954_v25 = vpop.f32.mrb[25].mxu0 }
 0x2bb   :  { %v708_v26 = vpack.c.bf16 %v702_v23, %v701_v22  ;;  %v955_v27 = vadd.f32 %v954_v25, %v953_v24  ;;  %v956_v28 = vpop.f32.mrb[26].mxu0 }
 0x2bc   :  { %v957_v29 = vpop.f32.mrb[27].mxu0 }
 0x2bd   :  { %v685_v30 = vadd.f32 %v955_v27, %v899_v6  ;;  %v958_v31 = vadd.f32 %v957_v29, %v956_v28  ;;  %994 = vmatmul.mubr.bf16.vlgmr.msra.gmra.mrb[32].mxu0 %v708_v26 }
 0x2bf   :  { %v688_v32 = vadd.f32 %v958_v31, %v899_v6  ;;  %v703_v33 = vmax.f32 %v685_v30, 0.0 }
 0x2c1   :  { %v704_v34 = vmax.f32 %v688_v32, 0.0  ;;  %v959_v35 = vpop.f32.mrb[28].mxu0 }
 0x2c2   :  { %v960_v36 = vpop.f32.mrb[29].mxu0 }
 0x2c3   :  { %v961_v37 = vadd.f32 %v960_v36, %v959_v35  ;;  %v962_v38 = vpop.f32.mrb[30].mxu0  ;;  %v709_v39 = vpack.c.bf16 %v704_v34, %v703_v33 }
 0x2c4   :  { %v963_v40 = vpop.f32.mrb[31].mxu0 }
 0x2c5   :  { %v693_v41 = vadd.f32 %v961_v37, %v899_v6  ;;  %v964_v42 = vadd.f32 %v963_v40, %v962_v38  ;;  %997 = vmatprep.mubr.bf16.mxu0 %v709_v39 }
 0x2c7   :  { %v696_v43 = vadd.f32 %v964_v42, %v899_v6  ;;  %v705_v44 = vmax.f32 %v693_v41, 0.0 }
 0x2c9   :  { %v706_v45 = vmax.f32 %v696_v43, 0.0 }
 0x2cb   :  { %v710_v46 = vpack.c.bf16 %v706_v45, %v705_v44 }
 0x2cd   :  { %998 = vmatmul.mubr.bf16.gmra.mrb[36].mxu0 %v710_v46 }
 0x390   :  { %v995_v48 = vpop.f32.mrb[32].mxu0 }
 0x391   :  { %v825_v49 = vadd.f32 %v995_v48, %v916_v47  ;;  %v816_v50 = vpop.f32.mrb[33].mxu0 }
 0x392   :  { %v817_v51 = vadd.f32 %v916_v47, %v816_v50  ;;  %v996_v52 = vpop.f32.mrb[34].mxu0 }
 0x393   :  { %850 = vst.msk [vmem:[%s1345_s9 + $0x10] sm:$0xff] %vm847_vm2, %v825_v49  ;;  %v828_v53 = vadd.f32 %v996_v52, %v916_v47  ;;  %v819_v54 = vpop.f32.mrb[35].mxu0 }
 0x394   :  { %848 = vst.msk [vmem:[%s1345_s9] sm:$0xff] %vm847_vm2, %v817_v51  ;;  %v820_v55 = vadd.f32 %v916_v47, %v819_v54 }
 0x395   :  { %851 = vst.msk [vmem:[%s1345_s9 + $0x18] sm:$0xff] %vm847_vm2, %v828_v53 }
 0x396   :  { %849 = vst.msk [vmem:[%s1345_s9 + $0x8] sm:$0xff] %vm847_vm2, %v820_v55 }
 0x3a0   :  { %v999_v56 = vpop.f32.mrb[36].mxu0 }
 0x3a1   :  { %v841_v57 = vadd.f32 %v999_v56, %v916_v47  ;;  %v832_v58 = vpop.f32.mrb[37].mxu0 }
 0x3a2   :  { %v833_v59 = vadd.f32 %v916_v47, %v832_v58  ;;  %v1000_v60 = vpop.f32.mrb[38].mxu0 }
 0x3a3   :  { %854 = vst.msk [vmem:[%s1345_s9 + $0x30] sm:$0xff] %vm847_vm2, %v841_v57  ;;  %v844_v63 = vadd.f32 %v1000_v60, %v916_v47  ;;  %v835_v1 = vpop.f32.mrb[39].mxu0 }
 0x3a4   :  { %852 = vst.msk [vmem:[%s1345_s9 + $0x20] sm:$0xff] %vm847_vm2, %v833_v59  ;;  %v836_v2 = vadd.f32 %v916_v47, %v835_v1 }
 0x3a5   :  { %855 = vst.msk [vmem:[%s1345_s9 + $0x38] sm:$0xff] %vm847_vm2, %v844_v63 }
 0x3a6   :  { %853 = vst.msk [vmem:[%s1345_s9 + $0x28] sm:$0xff] %vm847_vm2, %v836_v2 }
 0x3a7   :  { %860 = vsyncpa [#allocation3], 1 }

</bundles_post_ra>
